<compile_context>
chip_gen: v5e
topology: v5e:2x2
jax: 0.10.0
libtpu: 0.0.40
codegen_flags: <defaults>
</compile_context>

<pallas_src>
import functools

import jax
import jax.numpy as jnp
from jax.experimental import pallas as pl
from jax.experimental.pallas import tpu as pltpu


def _silly_kernel(x_ref, o_ref):
    """Net effect of SillyModel.forward on one (row_tile, lane_tile) block."""
    one = jnp.asarray(1, dtype=o_ref.dtype)
    # Full-block, unmasked lane-dense store: x + 1 everywhere.
    o_ref[...] = x_ref[...] + one

    # Row-0 fixup (the original module adds an extra +2 to x[0]).
    # Only the first row-block contains global row 0.
    @pl.when(pl.program_id(0) == 0)
    def _():
        o_ref[0, :] = x_ref[0, :] + jnp.asarray(3, dtype=o_ref.dtype)

    # TODO(synk): the Python-global `global_counter += 2` side effect has no
    # clean Pallas equivalent (host-side mutable global) and does not affect
    # the returned tensor, so it is omitted.


def _budgets():
    """(max_block_bytes, vmem_limit_bytes) sized for this TPU generation."""
    try:
        vmem_cap = int(pltpu.get_tpu_info().vmem_capacity_bytes)
    except Exception:  # be robust if the query is unavailable
        vmem_cap = 64 << 20                    # assume v7x-sized VMEM
    if vmem_cap >= (96 << 20):                 # v5e / v6e: 128 MiB VMEM
        return 20 << 20, 96 << 20
    return 8 << 20, 48 << 20                   # v7x: 64 MiB physical VMEM


def _round_down(n: int, unit: int) -> int:
    return (n // unit) * unit


def _pick_tiles(rows: int, feats: int, itemsize: int, max_block_bytes: int):
    """Pick (row_tile, lane_tile): lane-dense, VMEM-budgeted, >=2 grid blocks."""
    sub_unit = 8 * max(1, 4 // itemsize)       # f32->8, bf16->16, int8->32

    # Lane tile: prefer the full feature width (fully contiguous DMAs). Only
    # split lanes if even a sub_unit-row full-width block would blow the budget.
    if feats <= 128 or feats * itemsize * sub_unit <= max_block_bytes:
        lane_tile = feats
    else:
        lane_tile = max(
            128, _round_down(max_block_bytes // (itemsize * sub_unit), 128))
        lane_tile = min(lane_tile, max(128, _round_down(feats, 128)))

    # Row tile: as many rows as fit the per-block byte budget.
    if rows <= sub_unit:
        row_tile = rows
    else:
        cap = max(sub_unit, max_block_bytes // max(1, itemsize * lane_tile))
        row_tile = min(rows, _round_down(cap, sub_unit))
        if row_tile >= rows:
            row_tile = rows

    # Megacore: make sure there are >= 2 grid blocks so both v7x TensorCores
    # stream HBM. Extra cost elsewhere is ~0.35 us per added grid step.
    if pl.cdiv(rows, row_tile) * pl.cdiv(feats, lane_tile) < 2:
        if rows >= 2 * sub_unit:
            row_tile = max(sub_unit, _round_down(rows // 2, sub_unit))
        elif feats >= 2 * 128:
            lane_tile = max(128, _round_down(feats // 2, 128))

    return row_tile, lane_tile


def _forward_2d(x: jax.Array) -> jax.Array:
    rows, feats = x.shape
    itemsize = jnp.dtype(x.dtype).itemsize
    max_block_bytes, vmem_limit_bytes = _budgets()
    row_tile, lane_tile = _pick_tiles(rows, feats, itemsize, max_block_bytes)
    grid = (pl.cdiv(rows, row_tile), pl.cdiv(feats, lane_tile))
    n_elems = rows * feats

    return pl.pallas_call(
        _silly_kernel,
        out_shape=jax.ShapeDtypeStruct((rows, feats), x.dtype),
        grid=grid,
        in_specs=[pl.BlockSpec((row_tile, lane_tile), lambda i, j: (i, j))],
        out_specs=pl.BlockSpec((row_tile, lane_tile), lambda i, j: (i, j)),
        # Match the in-place `x += ...` semantics; reuse the input HBM buffer
        # (effective only because the caller is jitted with donate_argnums=0).
        input_output_aliases={0: 0},
        cost_estimate=pl.CostEstimate(
            flops=n_elems,
            transcendentals=0,
            bytes_accessed=2 * n_elems * itemsize),
        compiler_params=pltpu.CompilerParams(
            dimension_semantics=("parallel", "parallel"),
            vmem_limit_bytes=vmem_limit_bytes),
    )(x)


@functools.partial(jax.jit, donate_argnums=(0,))
def silly_model_forward(x: jax.Array) -> jax.Array:
    """Net effect of SillyModel.forward: x += 1; x[0] += 2.

    The input is DONATED (do not read `x` after calling this) so the Pallas
    input/output aliasing avoids a defensive full-array copy.
    """
    if x.ndim == 1:
        x2d = x.reshape(x.shape[0], 1)
    elif x.ndim == 2:
        x2d = x
    else:
        # x[0] indexes dim 0; flatten the trailing dims into one lane-dense axis.
        x2d = x.reshape(x.shape[0], -1)
    y2d = _forward_2d(x2d)
    return y2d.reshape(x.shape)


def _reference(x: jax.Array) -> jax.Array:
    """Pure-JAX reference of the documented net effect: x += 1; x[0] += 2."""
    y = x + jnp.asarray(1, x.dtype)
    return y.at[0].add(jnp.asarray(2, x.dtype))


if __name__ == "__main__":
    key = jax.random.PRNGKey(0)
    rows, feats = 64, 1024  # small demo shape; dim 0 is what `x[0]` indexes
    x = jax.random.normal(key, (rows, feats), dtype=jnp.float32)

    # Compute the reference first: the kernel donates (invalidates) its input.
    ref = jax.block_until_ready(_reference(x))

    out = jax.block_until_ready(silly_model_forward(x))

    assert out.shape == ref.shape and out.dtype == ref.dtype
    assert jnp.allclose(out, ref, atol=1e-6), "mismatch vs reference"

    print("KERNEL_OK")
</pallas_src>

<mosaic_0001>
module attributes {stable_mosaic.version = 11 : i64} {
  func.func @_silly_kernel(%arg0: i32, %arg1: i32, %arg2: memref<32x1024xf32, #tpu.memory_space<vmem>>, %arg3: memref<32x1024xf32, #tpu.memory_space<vmem>>) attributes {dimension_semantics = [#tpu.dimension_semantics<parallel>, #tpu.dimension_semantics<parallel>], iteration_bounds = array<i64: 2, 1>, scalar_prefetch = 0 : i64, scratch_operands = 0 : i64, tpu.core_type = #tpu.core_type<tc>, window_params = [{transform_indices = @transform_0, window_bounds = array<i64: 32, 1024>}, {transform_indices = @transform_1, window_bounds = array<i64: 32, 1024>}]} {
    %c0 = arith.constant 0 : index
    %c0_0 = arith.constant 0 : index
    %0 = vector.load %arg2[%c0, %c0_0] : memref<32x1024xf32, #tpu.memory_space<vmem>>, vector<32x1024xf32>
    %cst = arith.constant 1.000000e+00 : f32
    %1 = vector.broadcast %cst : f32 to vector<32x1024xf32>
    %2 = arith.addf %0, %1 : vector<32x1024xf32>
    %c0_1 = arith.constant 0 : index
    %c0_2 = arith.constant 0 : index
    %3 = vector.load %arg3[%c0_1, %c0_2] : memref<32x1024xf32, #tpu.memory_space<vmem>>, vector<32x1024xf32>
    tpu.vector_store %arg3[%c0_1, %c0_2], %2 {strides = array<i32>} : memref<32x1024xf32, #tpu.memory_space<vmem>>, vector<32x1024xf32>,
    %c0_i32 = arith.constant 0 : i32
    %4 = arith.cmpi eq, %arg0, %c0_i32 : i32
    %5 = arith.extui %4 : i1 to i32
    %c0_i32_3 = arith.constant 0 : i32
    %6 = arith.cmpi ne, %5, %c0_i32_3 : i32
    scf.if %6 {
      %c0_4 = arith.constant 0 : index
      %c0_5 = arith.constant 0 : index
      %7 = vector.load %arg2[%c0_4, %c0_5] : memref<32x1024xf32, #tpu.memory_space<vmem>>, vector<1x1024xf32>
      %8 = vector.shape_cast %7 : vector<1x1024xf32> to vector<1024xf32>
      %cst_6 = arith.constant 3.000000e+00 : f32
      %9 = vector.broadcast %cst_6 : f32 to vector<1024xf32>
      %10 = arith.addf %8, %9 : vector<1024xf32>
      %c0_7 = arith.constant 0 : index
      %c0_8 = arith.constant 0 : index
      %11 = vector.load %arg3[%c0_7, %c0_8] : memref<32x1024xf32, #tpu.memory_space<vmem>>, vector<1x1024xf32>
      %12 = vector.shape_cast %11 : vector<1x1024xf32> to vector<1024xf32>
      %13 = vector.shape_cast %10 : vector<1024xf32> to vector<1x1024xf32>
      tpu.vector_store %arg3[%c0_7, %c0_8], %13 {strides = array<i32>} : memref<32x1024xf32, #tpu.memory_space<vmem>>, vector<1x1024xf32>,
    } else {
    }
    return
  }
  func.func @transform_0(%arg0: i32, %arg1: i32) -> (i32, i32) {
    %c0_i32 = arith.constant 0 : i32
    return %arg0, %arg1 : i32, i32
  }
  func.func @transform_1(%arg0: i32, %arg1: i32) -> (i32, i32) {
    %c0_i32 = arith.constant 0 : i32
    return %arg0, %arg1 : i32, i32
  }
}

</mosaic_0001>

<bundles_post_ra>
// kernel: silly_model_forward.1
= control target key start
LH: loop header
LB: loop body
LE: loop exit
PB: predicated region body
PF: predicated region fallthrough
CT: control target
= control target key end

     0   :  { %6 = vsyncpa [#allocation3], 0  ;;  %s782_s0 = inlined_call_operand.hbm [shape: f32[64,1024], index: 0, kind: input, shape index: {}, may-alias: {0,1}]   ;;  %s783_s1 = inlined_call_operand.hbm [shape: f32[64,1024], index: 1, kind: output, shape index: {}, may-alias: {0,1}]  }
   0x1   :  { %8 = vsyncpa [#allocation3 + $0x1], 0 }
   0x2   :  { %9 = vsyncpa [#allocation4], 0 }
   0x3   :  { %11 = vsyncpa [#allocation4 + $0x1], 0  ;;  %s588_s6 = smov 0   ;;  %s590_s7 = smov 0  }
   0x4   :  { %s592_s8 = smov 0   ;;  %s594_s9 = smov 0  }
   0x5   :  { %s596_s10 = smov 0   ;;  %s598_s11 = smov 0  }
   0x6 LB: > { %s372_s12 = sadd.s32 4294967295, %s572_s11   ;;  %s373_s13 = sadd.s32 4294967294, %s572_s11   ;;  %s572_s11 = sphi %s598_s11, %s17_s11   ;;  %s568_s10 = sphi %s596_s10, %s792_s10   ;;  %s564_s9 = sphi %s594_s9, %s791_s9   ;;  %s560_s8 = sphi %s592_s8, %s790_s8   ;;  %s556_s7 = sphi %s590_s7, %s789_s7   ;;  %s552_s6 = sphi %s588_s6, %s788_s6  }
   0x7   : > { %s29_s14 = sadd.s32 1, %s568_s10  ;;  %s38_s15 = sadd.s32 1, %s560_s8 }
   0x8   : > { %p31_p0 = scmp.ge.s32.totalorder %s29_s14, 2  ;;  %p45_p1 = scmp.ne.s32.totalorder %s560_s8, %s556_s7 }
   0x9   : > { %p46_p2 = scmp.eq.s32.totalorder %s572_s11, 0  ;;  %p51_p3 = scmp.ne.s32.totalorder %s556_s7, %s552_s6 }
   0xa   : > { %s794_s14 = smov (%p31_p0, %s29_s14), 0  ;;  %p52_p5 = scmp.eq.s32.totalorder %s372_s12, 0 }
   0xb   : > { %p629_p4 = por %p46_p2, %p45_p1  ;;  %s33_s17 = ssub.s32 %s568_s10, %s794_s14 }
   0xc   : > { %p77_p6 = scmp.eq.s32.totalorder %s372_s12, 1  ;;  %p36_p7 = scmp.eq.s32.totalorder %s33_s17, 0 }
   0xd   : > { %p635_p8 = por %p52_p5, %p51_p3  ;;  %p83_p10 = scmp.eq.s32.totalorder %s373_s13, 1 }
   0xe   : > { %p639_p9 = por %p77_p6, %p45_p1  ;;  %p375_p12 = scmp.ge.s32.totalorder %s572_s11, 2 }
   0xf   : > { %s644_s20 = scalar_select %p36_p7, %s560_s8, %s38_s15  }
  0x10   : > { %p646_p11 = por %p83_p10, %p51_p3  ;;  %p406_p13 = scmp.lt.s32.totalorder %s572_s11, 2 }
  0x11   : > { %s103_s22 = sand.u32 1, %s560_s8   ;;  %s391_s24 = sshll.u32 %s568_s10, 8 }
  0x12   : > { %s376_s23 = sshll.u32 %s103_s22, 8  ;;  %s115_s27 = scalar_lea.hbm %s782_s0, %s391_s24 }
  0x13   : > { %s107_s28 = scalar_lea.vmem [#allocation2], %s376_s23  ;;  %s116_s30 = sshll.u32 %s115_s27, 4  ;;  %s117_s30 = int_to_ptr.hbm [resolvable:$true] %s116_s30 }
  0x14   : > { %s118_s29 = sshll.u32 %s107_s28, 4  ;;  %p399_p0 = pnand %p406_p13, %p629_p4  ;;  %s119_s29 = int_to_ptr.vmem [resolvable:$true] %s118_s29 }
  0x15   : > { %p380_p1 = scmp.ge.s32.totalorder %s572_s11, 1  ;;  %s104_s2 = scalar_lea.sflag [#allocation3], %s103_s22 }
  0x16   : > { %s574_s3 = smov 1024   ;;  %s575_s4 = smov 64  }
  0x17   : > { %401 = dma.hbm_to_vmem [thread:$0]  (!%p399_p0), %s117_s30, 4096, %s119_s29, %s104_s2, %s574_s3, %s574_s3, %s575_s4  }
  0x18   : > { %p126_p2 = scmp.lt.s32.totalorder %s572_s11, 3 }
  0x1a   : > { %p127_p3 = pnand %p380_p1, %p126_p2 }
  0x1b   : > { %s662_s5 = sand.u32 (!%p127_p3), 1, %s556_s7  }
  0x1c   : > { %130 = sbr.rel (%p127_p3) target bundleno = 93 (0x5d), region = 24  ;;  %s381_s12 = sshll.u32 (!%p127_p3), %s662_s5, 8 }
  0x1d   : > { %s133_s13 = scalar_lea.sflag (!%p127_p3), [#allocation3], %s662_s5  ;;  %s666_s15 = scalar_lea.vmem (!%p127_p3), [#allocation2], %s381_s12 }
  0x21   : > { %543 = dma.done.wait (%p635_p8), %s133_s13, 4096  }
  0x22   : > { %545 = vsyncadd (%p635_p8), %s133_s13, 4294963200  ;;  %v160_v0 = vld [vmem:[%s666_s15] sm:$0xff]  ;;  %v161_v1 = vld [vmem:[%s666_s15 + $0x8] sm:$0xff]  ;;  %s679_s16 = scalar_lea.vmem [#allocation5], %s381_s12  ;;  %p383_p4 = scmp.ne.s32.totalorder %s564_s9, 0 }
  0x23   : > { %v162_v2 = vld [vmem:[%s666_s15 + $0x10] sm:$0xff]  ;;  %v192_v3 = vadd.f32 1.0, %v160_v0  ;;  %v193_v4 = vadd.f32 1.0, %v161_v1  ;;  %v163_v6 = vld [vmem:[%s666_s15 + $0x18] sm:$0xff]  ;;  %v164_v7 = vld [vmem:[%s666_s15 + $0x20] sm:$0xff] }
  0x24   : > { %v194_v5 = vadd.f32 1.0, %v162_v2  ;;  %v165_v8 = vld [vmem:[%s666_s15 + $0x28] sm:$0xff]  ;;  %v195_v9 = vadd.f32 1.0, %v163_v6  ;;  %v166_v10 = vld [vmem:[%s666_s15 + $0x30] sm:$0xff]  ;;  %v196_v11 = vadd.f32 1.0, %v164_v7  ;;  %v167_v12 = vld [vmem:[%s666_s15 + $0x38] sm:$0xff] }
  0x25   : > { %224 = vst [vmem:[%s679_s16] sm:$0xff] %v192_v3  ;;  %v197_v13 = vadd.f32 1.0, %v165_v8  ;;  %v168_v14 = vld [vmem:[%s666_s15 + $0x40] sm:$0xff]  ;;  %v198_v15 = vadd.f32 1.0, %v166_v10  ;;  %v169_v16 = vld [vmem:[%s666_s15 + $0x48] sm:$0xff]  ;;  %v199_v17 = vadd.f32 1.0, %v167_v12  ;;  %v170_v18 = vld [vmem:[%s666_s15 + $0x50] sm:$0xff] }
  0x26   : > { %225 = vst [vmem:[%s679_s16 + $0x8] sm:$0xff] %v193_v4  ;;  %v200_v19 = vadd.f32 1.0, %v168_v14  ;;  %v171_v20 = vld [vmem:[%s666_s15 + $0x58] sm:$0xff]  ;;  %v201_v21 = vadd.f32 1.0, %v169_v16  ;;  %v172_v22 = vld [vmem:[%s666_s15 + $0x60] sm:$0xff]  ;;  %v202_v23 = vadd.f32 1.0, %v170_v18 }
  0x27   : > { %226 = vst [vmem:[%s679_s16 + $0x10] sm:$0xff] %v194_v5  ;;  %v173_v24 = vld [vmem:[%s666_s15 + $0x68] sm:$0xff]  ;;  %v203_v25 = vadd.f32 1.0, %v171_v20  ;;  %v174_v26 = vld [vmem:[%s666_s15 + $0x70] sm:$0xff]  ;;  %v204_v27 = vadd.f32 1.0, %v172_v22  ;;  %v175_v28 = vld [vmem:[%s666_s15 + $0x78] sm:$0xff] }
  0x28   : > { %227 = vst [vmem:[%s679_s16 + $0x18] sm:$0xff] %v195_v9  ;;  %v205_v29 = vadd.f32 1.0, %v173_v24  ;;  %v176_v30 = vld [vmem:[%s666_s15 + $0x80] sm:$0xff]  ;;  %v206_v31 = vadd.f32 1.0, %v174_v26  ;;  %v177_v32 = vld [vmem:[%s666_s15 + $0x88] sm:$0xff]  ;;  %v207_v33 = vadd.f32 1.0, %v175_v28 }
  0x29   : > { %228 = vst [vmem:[%s679_s16 + $0x20] sm:$0xff] %v196_v11  ;;  %v178_v34 = vld [vmem:[%s666_s15 + $0x90] sm:$0xff]  ;;  %v208_v35 = vadd.f32 1.0, %v176_v30  ;;  %v179_v36 = vld [vmem:[%s666_s15 + $0x98] sm:$0xff]  ;;  %v209_v37 = vadd.f32 1.0, %v177_v32  ;;  %v180_v38 = vld [vmem:[%s666_s15 + $0xa0] sm:$0xff] }
  0x2a   : > { %229 = vst [vmem:[%s679_s16 + $0x28] sm:$0xff] %v197_v13  ;;  %v210_v39 = vadd.f32 1.0, %v178_v34  ;;  %v181_v40 = vld [vmem:[%s666_s15 + $0xa8] sm:$0xff]  ;;  %v211_v41 = vadd.f32 1.0, %v179_v36  ;;  %v182_v42 = vld [vmem:[%s666_s15 + $0xb0] sm:$0xff]  ;;  %v212_v43 = vadd.f32 1.0, %v180_v38 }
  0x2b   : > { %230 = vst [vmem:[%s679_s16 + $0x30] sm:$0xff] %v198_v15  ;;  %v183_v44 = vld [vmem:[%s666_s15 + $0xb8] sm:$0xff]  ;;  %v213_v45 = vadd.f32 1.0, %v181_v40  ;;  %v184_v46 = vld [vmem:[%s666_s15 + $0xc0] sm:$0xff]  ;;  %v214_v47 = vadd.f32 1.0, %v182_v42  ;;  %v185_v48 = vld [vmem:[%s666_s15 + $0xc8] sm:$0xff] }
  0x2c   : > { %231 = vst [vmem:[%s679_s16 + $0x38] sm:$0xff] %v199_v17  ;;  %v215_v49 = vadd.f32 1.0, %v183_v44  ;;  %v186_v50 = vld [vmem:[%s666_s15 + $0xd0] sm:$0xff]  ;;  %v216_v51 = vadd.f32 1.0, %v184_v46  ;;  %v187_v52 = vld [vmem:[%s666_s15 + $0xd8] sm:$0xff]  ;;  %v217_v53 = vadd.f32 1.0, %v185_v48 }
  0x2d   : > { %232 = vst [vmem:[%s679_s16 + $0x40] sm:$0xff] %v200_v19  ;;  %v188_v54 = vld [vmem:[%s666_s15 + $0xe0] sm:$0xff]  ;;  %v218_v55 = vadd.f32 1.0, %v186_v50  ;;  %v189_v56 = vld [vmem:[%s666_s15 + $0xe8] sm:$0xff]  ;;  %v219_v57 = vadd.f32 1.0, %v187_v52  ;;  %v190_v58 = vld [vmem:[%s666_s15 + $0xf0] sm:$0xff] }
  0x2e   : > { %233 = vst [vmem:[%s679_s16 + $0x48] sm:$0xff] %v201_v21  ;;  %v220_v59 = vadd.f32 1.0, %v188_v54  ;;  %v191_v60 = vld [vmem:[%s666_s15 + $0xf8] sm:$0xff]  ;;  %v221_v61 = vadd.f32 1.0, %v189_v56  ;;  %v222_v62 = vadd.f32 1.0, %v190_v58 }
  0x2f   : > { %234 = vst [vmem:[%s679_s16 + $0x50] sm:$0xff] %v202_v23  ;;  %v223_v63 = vadd.f32 1.0, %v191_v60 }
  0x30   : > { %235 = vst [vmem:[%s679_s16 + $0x58] sm:$0xff] %v203_v25 }
  0x31   : > { %236 = vst [vmem:[%s679_s16 + $0x60] sm:$0xff] %v204_v27 }
  0x32   : > { %237 = vst [vmem:[%s679_s16 + $0x68] sm:$0xff] %v205_v29 }
  0x33   : > { %238 = vst [vmem:[%s679_s16 + $0x70] sm:$0xff] %v206_v31 }
  0x34   : > { %239 = vst [vmem:[%s679_s16 + $0x78] sm:$0xff] %v207_v33 }
  0x35   : > { %240 = vst [vmem:[%s679_s16 + $0x80] sm:$0xff] %v208_v35 }
  0x36   : > { %241 = vst [vmem:[%s679_s16 + $0x88] sm:$0xff] %v209_v37 }
  0x37   : > { %242 = vst [vmem:[%s679_s16 + $0x90] sm:$0xff] %v210_v39 }
  0x38   : > { %243 = vst [vmem:[%s679_s16 + $0x98] sm:$0xff] %v211_v41 }
  0x39   : > { %244 = vst [vmem:[%s679_s16 + $0xa0] sm:$0xff] %v212_v43 }
  0x3a   : > { %245 = vst [vmem:[%s679_s16 + $0xa8] sm:$0xff] %v213_v45 }
  0x3b   : > { %246 = vst [vmem:[%s679_s16 + $0xb0] sm:$0xff] %v214_v47 }
  0x3c   : > { %247 = vst [vmem:[%s679_s16 + $0xb8] sm:$0xff] %v215_v49 }
  0x3d   : > { %248 = vst [vmem:[%s679_s16 + $0xc0] sm:$0xff] %v216_v51 }
  0x3e   : > { %249 = vst [vmem:[%s679_s16 + $0xc8] sm:$0xff] %v217_v53 }
  0x3f   : > { %250 = vst [vmem:[%s679_s16 + $0xd0] sm:$0xff] %v218_v55 }
  0x40   : > { %251 = vst [vmem:[%s679_s16 + $0xd8] sm:$0xff] %v219_v57  ;;  %259 = sbr.rel (%p383_p4) target bundleno = 77 (0x4d), region = 32 }
  0x41   : > { %252 = vst [vmem:[%s679_s16 + $0xe0] sm:$0xff] %v220_v59 }
  0x42   : > { %253 = vst [vmem:[%s679_s16 + $0xe8] sm:$0xff] %v221_v61 }
  0x43   : > { %254 = vst [vmem:[%s679_s16 + $0xf0] sm:$0xff] %v222_v62 }
  0x44   : > { %255 = vst [vmem:[%s679_s16 + $0xf8] sm:$0xff] %v223_v63 }
  0x45   : > { %v260_v0 = vld [vmem:[%s666_s15] ss:$8 sm:$0xf] }
  0x46   : > { %v261_v1 = vld [vmem:[%s666_s15] ss:$8 sm:$0xf0] }
  0x47   : > { %v262_v2 = vor.u32 %v261_v1, %v260_v0 }
  0x49   : > { %v263_v3 = vadd.f32 3.0, %v262_v2 }
  0x4b   : > { %264 = vst [vmem:[%s679_s16] ss:$8 sm:$0xf] %v263_v3 }
  0x4c   : > { %265 = vst [vmem:[%s679_s16] ss:$8 sm:$0xf0] %v263_v3 }
  0x4d PF: > { %s393_s17 = sshll.u32 %s564_s9, 8  ;;  %s282_s24 = sshll.u32 %s679_s16, 4  ;;  %s283_s24 = int_to_ptr.vmem [resolvable:$true] %s282_s24 }
  0x4e   : > { %s281_s23 = scalar_lea.hbm %s783_s1, %s393_s17  ;;  %s267_s26 = scalar_lea.sflag [#allocation4], %s662_s5 }
  0x4f   : > { %s284_s25 = sshll.u32 %s281_s23, 4  ;;  %s510_s9 = scalar_lea.hbm %s783_s1, 512  ;;  %s285_s25 = int_to_ptr.hbm [resolvable:$true] %s284_s25 }
  0x50   : > { %s504_s27 = sshra.s32 %s285_s25, 4  ;;  %s505_s27 = int_to_ptr.hbm [resolvable:$true] %s504_s27 }
  0x51   : > { %s506_s28 = scalar_lea.hbm %s505_s27, 256  ;;  %p511_p8 = scmp.lt.s32.totalorder %s505_s27, %s783_s1 }
  0x52   : > { %p507_p5 = scmp.ne.s32.totalorder %s505_s27, %s506_s28  ;;  %p512_p10 = scmp.lt.s32.totalorder %s510_s9, %s506_s28 }
  0x54   : > { %p508_p6 = pnand %p507_p5, %p639_p9  ;;  %p513_p13 = por %p512_p10, %p511_p8 }
  0x56   : > { %p509_p7 = pneg %p508_p6 }
  0x58   : > { %p514_p0 = pnand %p513_p13, %p509_p7 }
  0x5a   : > { %517 = shalt.err (!%p514_p0)
}
  0x5b   : > { %s576_s4 = smov 1024   ;;  %s577_s5 = smov 64  }
  0x5c   : > { %396 = dma.vmem_to_hbm [thread:$0]  (%p639_p9), %s283_s24, 4096, %s285_s25, %s267_s26, %s576_s4, %s576_s4, %s577_s5  }
  0x5d PF: > { %s299_s12 = sand.u32 1, %s552_s6   ;;  %p403_p1 = pnand %p375_p12, %p646_p11 }
  0x5e   : > { %s300_s13 = scalar_lea.sflag [#allocation4], %s299_s12 }
  0x5f   : > { %p404_p2 = pneg %p403_p1 }
  0x61   : > { %547 = dma.done.wait (%p404_p2), %s300_s13, 4096  }
  0x62   : > { %549 = vsyncadd (%p404_p2), %s300_s13, 4294963200  ;;  %s17_s11 = sadd.s32 1, %s572_s11   ;;  %s788_s6 = smov %s556_s7 }
  0x63   : > { %p14_p3 = scmp.ge.s32.totalorder %s17_s11, 4   ;;  %s789_s7 = smov %s560_s8 }
  0x64   : > { %s790_s8 = smov %s644_s20  ;;  %s791_s9 = smov %s568_s10 }
  0x65   : > { %s792_s10 = smov %s794_s14  ;;  %16 = sbr.rel (!%p14_p3) target bundleno = 6 (0x6), region = 73 }
  0x6a   :  { %306 = vsyncpa [#allocation3], 1 }
  0x6b   :  { %308 = vsyncpa [#allocation3 + $0x1], 1 }
  0x6c   :  { %309 = vsyncpa [#allocation4], 1 }
  0x6d   :  { %311 = vsyncpa [#allocation4 + $0x1], 1 }

</bundles_post_ra>
